<compile_context>
chip_gen: v5e
topology: v5e:2x2
jax: 0.10.0
libtpu: 0.0.40
codegen_flags: <defaults>
</compile_context>

<pallas_src>
import functools
import math

import jax
import jax.numpy as jnp
from jax import lax
from jax.experimental import pallas as pl
from jax.experimental.pallas import tpu as pltpu

EPS_NORM2 = 1e-24      # (F.normalize eps = 1e-12) ** 2
EPS_BN = 1e-5          # nn.BatchNorm1d eps


# ----------------------------- in-kernel helpers ----------------------------

def _l2norm_rows(y):
    # F.normalize(y, p=2, dim=-1):  y / max(||y||, eps)  ==  y * rsqrt(max(ss, eps^2))
    ss = jnp.sum(y * y, axis=-1, keepdims=True)
    return y * lax.rsqrt(jnp.maximum(ss, EPS_NORM2))


def _bn_list(ys):
    # Fresh nn.BatchNorm1d (training mode, identity affine) applied to a
    # (B, C, L) tensor represented as a list of B 2-D (C, L) slices:
    # per-channel stats over (batch, L), biased variance, single pass + rsqrt.
    cnt = float(len(ys) * ys[0].shape[1])
    s1 = sum(jnp.sum(y, axis=1, keepdims=True) for y in ys)
    s2 = sum(jnp.sum(y * y, axis=1, keepdims=True) for y in ys)
    mean = s1 / cnt
    var = jnp.maximum(s2 / cnt - mean * mean, 0.0)
    inv = lax.rsqrt(var + EPS_BN)
    return [(y - mean) * inv for y in ys]


# ------------------------------- Pallas kernels -----------------------------

def _conv_sim_bn_kernel(x_ref, adj_ref, w_ref, b_ref, xo_ref, sim_ref, bno_ref):
    """Fused: GraphConv (+L2 normalize +ReLU), symmetric feature-similarity, BN."""
    B = x_ref.shape[0]
    w = w_ref[...]                                   # (Fin, Fout)
    bias = b_ref[...]                                # (1, Fout)
    ys = []
    for b in range(B):                               # static unroll, tiny B
        x = x_ref[b]                                 # (N, Fin)
        adj = adj_ref[b]                             # (N, N)
        y = jnp.dot(jnp.dot(adj, x, preferred_element_type=jnp.float32), w,
                    preferred_element_type=jnp.float32) + bias
        y = _l2norm_rows(y)                          # normalize_embedding
        y = jnp.maximum(y, 0.0)                      # ReLU
        xo_ref[b] = y
        ys.append(y)
        # x_sim = x^T @ row_normalize(x), symmetrized; transposes folded into
        # the contractions (A^T B via dot_general, no explicit transpose).
        yn = _l2norm_rows(y)
        s = lax.dot_general(y, yn, (((0,), (0,)), ((), ())),
                            preferred_element_type=jnp.float32)     # (Fout, Fout)
        st = lax.dot_general(yn, y, (((0,), (0,)), ((), ())),
                             preferred_element_type=jnp.float32)    # = S^T
        sim_ref[b] = 0.5 * (s + st)
    # BatchNorm1d(N): per-node statistics over (batch, feature).
    for b, yb in enumerate(_bn_list(ys)):
        bno_ref[b] = yb


def _tail_kernel(*refs, n_branch, n_block):
    """Fused: all read/pooling branches + conv_last + max + concat + pred MLP."""
    o_ref = refs[-1]
    adj_ref, hbn_ref, wlast_ref, blast_ref, w1_ref, b1_ref, w2_ref, b2_ref = refs[:8]
    branch_refs = refs[8:-1]
    per_branch = 3 + 2 * (n_block + 2)

    B = adj_ref.shape[0]
    H = branch_refs[1].shape[1]                      # sim is (B, H, H)

    w_last = wlast_ref[...]                          # (H, E)
    b_last = blast_ref[...]                          # (1, E)
    w1 = w1_ref[...]                                 # (n_branch*H + E, Dh)
    b1 = b1_ref[...]                                 # (1, Dh)
    w2 = w2_ref[...]                                 # (Dh, Dout)
    b2 = b2_ref[...]                                 # (1, Dout)

    # Per-sample accumulator of the first MLP layer (replaces concat + matmul).
    accs = [b1 for _ in range(B)]

    rows = lax.broadcasted_iota(jnp.int32, (H, H), 0)
    cols = lax.broadcasted_iota(jnp.int32, (H, H), 1)
    eye = (rows == cols).astype(jnp.float32)

    # ---------------- read / pooling branches (forward_na stacks) ------------
    for r in range(n_branch):
        base = r * per_branch
        x_ref = branch_refs[base]                    # (B, N, H)   activation x_r
        sim_ref = branch_refs[base + 1]              # (B, H, H)
        thr_ref = branch_refs[base + 2]              # (B, 1, 1)
        wrefs = branch_refs[base + 3: base + per_branch]

        # fea_A = sign(relu(sim - thr)); adj_hat = fea_A + I
        adj_hats = []
        for b in range(B):
            fea = (sim_ref[b] > thr_ref[b]).astype(jnp.float32)
            adj_hats.append(fea + eye)
        # Reference quirk: degrees are taken from batch element 1 only.
        a1 = adj_hats[1]
        d_r = lax.rsqrt(jnp.sum(a1, axis=1, keepdims=True))         # (H, 1)
        d_c = lax.rsqrt(jnp.sum(a1, axis=0, keepdims=True))         # (1, H)
        scale = d_r * d_c                                           # (H, H)
        adj_ns = [a * scale for a in adj_hats]

        wf = wrefs[0][...]                            # (N, hidden)
        bf = wrefs[1][...]                            # (1, hidden)
        ys = []
        for b in range(B):
            # adj_n @ x_r^T with the transpose folded into the contraction.
            t = lax.dot_general(adj_ns[b], x_ref[b], (((1,), (1,)), ((), ())),
                                preferred_element_type=jnp.float32)  # (H, N)
            y = jnp.dot(t, wf, preferred_element_type=jnp.float32) + bf
            ys.append(jnp.maximum(y, 0.0))
        ys = _bn_list(ys)
        for i in range(n_block):
            wb = wrefs[2 + 2 * i][...]
            bb = wrefs[3 + 2 * i][...]
            nxt = []
            for b in range(B):
                t = jnp.dot(adj_ns[b], ys[b], preferred_element_type=jnp.float32)
                y = jnp.dot(t, wb, preferred_element_type=jnp.float32) + bb
                nxt.append(jnp.maximum(y, 0.0))
            ys = _bn_list(nxt)
        wlr = wrefs[2 + 2 * n_block][...]             # (hidden, 1)
        blr = wrefs[3 + 2 * n_block][...]             # (1, 1)
        w1_r = w1[r * H:(r + 1) * H]                  # rows of pred W1 for this branch
        for b in range(B):
            t = jnp.dot(adj_ns[b], ys[b], preferred_element_type=jnp.float32)
            out_rb = jnp.dot(t, wlr, preferred_element_type=jnp.float32) + blr   # (H, 1)
            # out_rb^T @ w1_r without materializing the transpose.
            accs[b] = accs[b] + lax.dot_general(
                out_rb, w1_r, (((0,), (0,)), ((), ())),
                preferred_element_type=jnp.float32)                  # (1, Dh)

    # ---------------- conv_last + max over nodes + prediction head -----------
    w1_last = w1[n_branch * H:]                       # (E, Dh)
    for b in range(B):
        t = jnp.dot(adj_ref[b], hbn_ref[b], preferred_element_type=jnp.float32)  # (N, H)
        y = jnp.dot(t, w_last, preferred_element_type=jnp.float32) + b_last      # (N, E)
        y = _l2norm_rows(y)                           # normalize_embedding (no ReLU)
        m = jnp.max(y, axis=0, keepdims=True)         # (1, E)   max over nodes
        acc = accs[b] + jnp.dot(m, w1_last, preferred_element_type=jnp.float32)
        hcur = jnp.maximum(acc, 0.0)                  # (1, Dh)
        o_ref[b] = jnp.dot(hcur, w2, preferred_element_type=jnp.float32) + b2    # (1, Dout)


# ------------------------------- wrappers -----------------------------------

def _full_spec(shape):
    nd = len(shape)
    return pl.BlockSpec(shape, lambda i, _nd=nd: (0,) * _nd)


def conv_sim_bn(x, adj, w, b):
    B, N, _ = x.shape
    Fout = w.shape[1]
    out_shapes = (
        jax.ShapeDtypeStruct((B, N, Fout), jnp.float32),     # x (post norm + relu)
        jax.ShapeDtypeStruct((B, Fout, Fout), jnp.float32),  # symmetrized similarity
        jax.ShapeDtypeStruct((B, N, Fout), jnp.float32),     # BN(x)
    )
    return pl.pallas_call(
        _conv_sim_bn_kernel,
        out_shape=out_shapes,
        grid=(1,),
        in_specs=[_full_spec(a.shape) for a in (x, adj, w, b)],
        out_specs=tuple(_full_spec(s.shape) for s in out_shapes),
        compiler_params=pltpu.CompilerParams(dimension_semantics=("arbitrary",)),
    )(x, adj, w, b)


def tail_predict(adj, h_bn, branches, thrs, conv_last, pred, n_block):
    B = adj.shape[0]
    H = branches[0][1].shape[1]
    w_last, b_last = conv_last
    (w1, b1), (w2, b2) = pred
    label_dim = w2.shape[1]
    assert w1.shape[0] == len(branches) * H + w_last.shape[1]

    inputs = [adj, h_bn, w_last, b_last, w1, b1, w2, b2]
    for r, (x_r, sim_r, rp) in enumerate(branches):
        inputs += [x_r, sim_r, thrs[r]]
        inputs += [rp["first"][0], rp["first"][1]]
        for (wb, bb) in rp["blocks"]:
            inputs += [wb, bb]
        inputs += [rp["last"][0], rp["last"][1]]

    kern = functools.partial(_tail_kernel, n_branch=len(branches), n_block=n_block)
    out = pl.pallas_call(
        kern,
        out_shape=jax.ShapeDtypeStruct((B, 1, label_dim), jnp.float32),
        grid=(1,),
        in_specs=[_full_spec(a.shape) for a in inputs],
        out_specs=_full_spec((B, 1, label_dim)),
        compiler_params=pltpu.CompilerParams(dimension_semantics=("arbitrary",)),
    )(*inputs)
    return out.reshape(B, label_dim)


def gcn_egc_forward(params, x, adj, ratio):
    H = params["conv_first"][0].shape[1]
    n_block = len(params["conv_block"])

    # Layer 1 (conv_first) + every conv_block layer: fused conv/sim/BN kernel.
    x1, sim1, h = conv_sim_bn(x, adj, *params["conv_first"])
    branches = [(x1, sim1, params["read"])]
    for (w, b) in params["conv_block"]:
        x2, sim2, h = conv_sim_bn(h, adj, w, b)
        branches.append((x2, sim2, params["read_after_pool"]))

    # k-th-largest threshold per (branch, batch) similarity matrix.
    # TODO(synk): descending-sort / k-th-largest selection kept in plain JAX —
    # no clean sort primitive inside a TPU Pallas kernel.
    sims = jnp.stack([s for (_, s, _) in branches])          # (R, B, H, H)
    R, B = sims.shape[0], sims.shape[1]
    node_num = min(int(H * H * ratio), H * H - 1)            # clamp (OOB guard)
    thr = jnp.sort(sims.reshape(R * B, H * H), axis=1)[:, H * H - 1 - node_num]
    thrs = thr.reshape(R, B, 1, 1)

    # All pooling/read branches + conv_last + max + concat + MLP in one kernel.
    return tail_predict(adj, h, branches, thrs, params["conv_last"],
                        params["pred"], n_block)


# ----------------------------- parameter init -------------------------------

def _xavier_relu(key, fan_in, fan_out):
    gain = math.sqrt(2.0)                                    # calculate_gain('relu')
    bound = gain * math.sqrt(6.0 / (fan_in + fan_out))
    return jax.random.uniform(key, (fan_in, fan_out), jnp.float32, -bound, bound)


def init_params(key, N, input_dim, hidden, embedding, label_dim, num_layers,
                num_pooling=1, pred_hidden=50):
    keys = iter(jax.random.split(key, 64))

    def gc(fin, fout):
        return _xavier_relu(next(keys), fin, fout), jnp.zeros((1, fout), jnp.float32)

    def lin(fin, fout):
        bound = 1.0 / math.sqrt(fin)
        kw, kb = jax.random.split(next(keys))
        w = jax.random.uniform(kw, (fin, fout), jnp.float32, -bound, bound)
        b = jax.random.uniform(kb, (1, fout), jnp.float32, -bound, bound)
        return w, b

    def read_set():
        return {
            "first": gc(N, hidden),
            "blocks": [gc(hidden, hidden) for _ in range(num_layers - 2)],
            "last": gc(hidden, 1),
        }

    params = {
        "conv_first": gc(input_dim, hidden),
        "conv_block": [gc(hidden, hidden) for _ in range(num_layers - 2)],
        "conv_last": gc(hidden, embedding),
        "read": read_set(),
        "read_after_pool": read_set(),
    }
    pred_in = hidden * (num_pooling + 1) + embedding         # pool_concat branch
    params["pred"] = [lin(pred_in, pred_hidden), lin(pred_hidden, label_dim)]
    return params


# ---------------------------------- main -------------------------------------

if __name__ == "__main__":
    B = 2                 # batch_size
    N = 16                # max_num_nodes
    input_dim = 4
    hidden = 32
    embedding = 16
    label_dim = 6
    num_layers = 3        # num_pooling=1 -> concat width 2*H + E matches pred
    ratio = 0.25

    key = jax.random.PRNGKey(0)
    kx, ka, kp = jax.random.split(key, 3)

    x = jax.random.normal(kx, (B, N, input_dim), jnp.float32)
    a = jax.random.uniform(ka, (B, N, N), jnp.float32)
    adj = ((a + jnp.transpose(a, (0, 2, 1))) > 1.0).astype(jnp.float32)  # symmetric 0/1

    params = init_params(kp, N, input_dim, hidden, embedding, label_dim, num_layers)

    ypred = gcn_egc_forward(params, x, adj, ratio)
    jax.block_until_ready(ypred)
    assert ypred.shape == (B, label_dim)
    print("KERNEL_OK")
</pallas_src>

<mosaic_0001>
module attributes {stable_mosaic.version = 11 : i64} {
  func.func @_conv_sim_bn_kernel(%arg0: i32, %arg1: memref<2x16x4xf32, #tpu.memory_space<vmem>>, %arg2: memref<2x16x16xf32, #tpu.memory_space<vmem>>, %arg3: memref<4x32xf32, #tpu.memory_space<vmem>>, %arg4: memref<1x32xf32, #tpu.memory_space<vmem>>, %arg5: memref<2x16x32xf32, #tpu.memory_space<vmem>>, %arg6: memref<2x32x32xf32, #tpu.memory_space<vmem>>, %arg7: memref<2x16x32xf32, #tpu.memory_space<vmem>>) attributes {dimension_semantics = [#tpu.dimension_semantics<arbitrary>], iteration_bounds = array<i64: 1>, scalar_prefetch = 0 : i64, scratch_operands = 0 : i64, tpu.core_type = #tpu.core_type<tc>, window_params = [{pipeline_mode = #tpu.pipeline_mode<synchronous>, transform_indices = @transform_0, window_bounds = array<i64: 2, 16, 4>}, {pipeline_mode = #tpu.pipeline_mode<synchronous>, transform_indices = @transform_1, window_bounds = array<i64: 2, 16, 16>}, {pipeline_mode = #tpu.pipeline_mode<synchronous>, transform_indices = @transform_2, window_bounds = array<i64: 4, 32>}, {pipeline_mode = #tpu.pipeline_mode<synchronous>, transform_indices = @transform_3, window_bounds = array<i64: 1, 32>}, {pipeline_mode = #tpu.pipeline_mode<synchronous>, transform_indices = @transform_4, window_bounds = array<i64: 2, 16, 32>}, {pipeline_mode = #tpu.pipeline_mode<synchronous>, transform_indices = @transform_5, window_bounds = array<i64: 2, 32, 32>}, {pipeline_mode = #tpu.pipeline_mode<synchronous>, transform_indices = @transform_6, window_bounds = array<i64: 2, 16, 32>}]} {
    %c0 = arith.constant 0 : index
    %c0_0 = arith.constant 0 : index
    %0 = vector.load %arg3[%c0, %c0_0] : memref<4x32xf32, #tpu.memory_space<vmem>>, vector<4x32xf32>
    %c0_1 = arith.constant 0 : index
    %c0_2 = arith.constant 0 : index
    %1 = vector.load %arg4[%c0_1, %c0_2] : memref<1x32xf32, #tpu.memory_space<vmem>>, vector<1x32xf32>
    %c0_3 = arith.constant 0 : index
    %c0_4 = arith.constant 0 : index
    %c0_5 = arith.constant 0 : index
    %2 = vector.load %arg1[%c0_3, %c0_4, %c0_5] : memref<2x16x4xf32, #tpu.memory_space<vmem>>, vector<1x16x4xf32>
    %3 = vector.shape_cast %2 : vector<1x16x4xf32> to vector<16x4xf32>
    %c0_6 = arith.constant 0 : index
    %c0_7 = arith.constant 0 : index
    %c0_8 = arith.constant 0 : index
    %4 = vector.load %arg2[%c0_6, %c0_7, %c0_8] : memref<2x16x16xf32, #tpu.memory_space<vmem>>, vector<1x16x16xf32>
    %5 = vector.shape_cast %4 : vector<1x16x16xf32> to vector<16x16xf32>
    %cst = arith.constant dense<0.000000e+00> : vector<16x4xf32>
    %6 = tpu.matmul %5, %3, %cst {dimension_numbers = #tpu.dot_dimension_numbers<[1], [0], [0], [1], [0, 0, 1, 1], [], []>} : vector<16x16xf32>, vector<16x4xf32>, vector<16x4xf32> -> vector<16x4xf32>
    %cst_9 = arith.constant dense<0.000000e+00> : vector<16x32xf32>
    %7 = tpu.matmul %6, %0, %cst_9 {dimension_numbers = #tpu.dot_dimension_numbers<[1], [0], [0], [1], [0, 0, 1, 1], [], []>} : vector<16x4xf32>, vector<4x32xf32>, vector<16x32xf32> -> vector<16x32xf32>
    %8 = vector.broadcast %1 : vector<1x32xf32> to vector<16x32xf32>
    %9 = arith.addf %7, %8 : vector<16x32xf32>
    %10 = arith.mulf %9, %9 : vector<16x32xf32>
    %cst_10 = arith.constant dense<0.000000e+00> : vector<16xf32>
    %11 = vector.multi_reduction <add>, %10, %cst_10 [1] : vector<16x32xf32> to vector<16xf32>
    %12 = vector.shape_cast %11 : vector<16xf32> to vector<16x1xf32>
    %cst_11 = arith.constant 1.000000e-24 : f32
    %13 = vector.broadcast %cst_11 : f32 to vector<16x1xf32>
    %14 = arith.maximumf %12, %13 : vector<16x1xf32>
    %15 = math.rsqrt %14 : vector<16x1xf32>
    %16 = vector.broadcast %15 : vector<16x1xf32> to vector<16x32xf32>
    %17 = arith.mulf %9, %16 : vector<16x32xf32>
    %cst_12 = arith.constant 0.000000e+00 : f32
    %18 = vector.broadcast %cst_12 : f32 to vector<16x32xf32>
    %19 = arith.maximumf %17, %18 : vector<16x32xf32>
    %c0_13 = arith.constant 0 : index
    %c0_14 = arith.constant 0 : index
    %c0_15 = arith.constant 0 : index
    %20 = vector.load %arg5[%c0_13, %c0_14, %c0_15] : memref<2x16x32xf32, #tpu.memory_space<vmem>>, vector<1x16x32xf32>
    %21 = vector.shape_cast %20 : vector<1x16x32xf32> to vector<16x32xf32>
    %22 = vector.shape_cast %19 : vector<16x32xf32> to vector<1x16x32xf32>
    tpu.vector_store %arg5[%c0_13, %c0_14, %c0_15], %22 {strides = array<i32>} : memref<2x16x32xf32, #tpu.memory_space<vmem>>, vector<1x16x32xf32>,
    %23 = arith.mulf %19, %19 : vector<16x32xf32>
    %cst_16 = arith.constant dense<0.000000e+00> : vector<16xf32>
    %24 = vector.multi_reduction <add>, %23, %cst_16 [1] : vector<16x32xf32> to vector<16xf32>
    %25 = vector.shape_cast %24 : vector<16xf32> to vector<16x1xf32>
    %cst_17 = arith.constant 1.000000e-24 : f32
    %26 = vector.broadcast %cst_17 : f32 to vector<16x1xf32>
    %27 = arith.maximumf %25, %26 : vector<16x1xf32>
    %28 = math.rsqrt %27 : vector<16x1xf32>
    %29 = vector.broadcast %28 : vector<16x1xf32> to vector<16x32xf32>
    %30 = arith.mulf %19, %29 : vector<16x32xf32>
    %cst_18 = arith.constant dense<0.000000e+00> : vector<32x32xf32>
    %31 = tpu.matmul %19, %30, %cst_18 {dimension_numbers = #tpu.dot_dimension_numbers<[0], [0], [1], [1], [0, 1, 1, 1], [], []>} : vector<16x32xf32>, vector<16x32xf32>, vector<32x32xf32> -> vector<32x32xf32>
    %cst_19 = arith.constant dense<0.000000e+00> : vector<32x32xf32>
    %32 = tpu.matmul %30, %19, %cst_19 {dimension_numbers = #tpu.dot_dimension_numbers<[0], [0], [1], [1], [0, 1, 1, 1], [], []>} : vector<16x32xf32>, vector<16x32xf32>, vector<32x32xf32> -> vector<32x32xf32>
    %33 = arith.addf %31, %32 : vector<32x32xf32>
    %cst_20 = arith.constant 5.000000e-01 : f32
    %34 = vector.broadcast %cst_20 : f32 to vector<32x32xf32>
    %35 = arith.mulf %34, %33 : vector<32x32xf32>
    %c0_21 = arith.constant 0 : index
    %c0_22 = arith.constant 0 : index
    %c0_23 = arith.constant 0 : index
    %36 = vector.load %arg6[%c0_21, %c0_22, %c0_23] : memref<2x32x32xf32, #tpu.memory_space<vmem>>, vector<1x32x32xf32>
    %37 = vector.shape_cast %36 : vector<1x32x32xf32> to vector<32x32xf32>
    %38 = vector.shape_cast %35 : vector<32x32xf32> to vector<1x32x32xf32>
    tpu.vector_store %arg6[%c0_21, %c0_22, %c0_23], %38 {strides = array<i32>} : memref<2x32x32xf32, #tpu.memory_space<vmem>>, vector<1x32x32xf32>,
    %c1 = arith.constant 1 : index
    %c0_24 = arith.constant 0 : index
    %c0_25 = arith.constant 0 : index
    %39 = vector.load %arg1[%c1, %c0_24, %c0_25] : memref<2x16x4xf32, #tpu.memory_space<vmem>>, vector<1x16x4xf32>
    %40 = vector.shape_cast %39 : vector<1x16x4xf32> to vector<16x4xf32>
    %c1_26 = arith.constant 1 : index
    %c0_27 = arith.constant 0 : index
    %c0_28 = arith.constant 0 : index
    %41 = vector.load %arg2[%c1_26, %c0_27, %c0_28] : memref<2x16x16xf32, #tpu.memory_space<vmem>>, vector<1x16x16xf32>
    %42 = vector.shape_cast %41 : vector<1x16x16xf32> to vector<16x16xf32>
    %cst_29 = arith.constant dense<0.000000e+00> : vector<16x4xf32>
    %43 = tpu.matmul %42, %40, %cst_29 {dimension_numbers = #tpu.dot_dimension_numbers<[1], [0], [0], [1], [0, 0, 1, 1], [], []>} : vector<16x16xf32>, vector<16x4xf32>, vector<16x4xf32> -> vector<16x4xf32>
    %cst_30 = arith.constant dense<0.000000e+00> : vector<16x32xf32>
    %44 = tpu.matmul %43, %0, %cst_30 {dimension_numbers = #tpu.dot_dimension_numbers<[1], [0], [0], [1], [0, 0, 1, 1], [], []>} : vector<16x4xf32>, vector<4x32xf32>, vector<16x32xf32> -> vector<16x32xf32>
    %45 = vector.broadcast %1 : vector<1x32xf32> to vector<16x32xf32>
    %46 = arith.addf %44, %45 : vector<16x32xf32>
    %47 = arith.mulf %46, %46 : vector<16x32xf32>
    %cst_31 = arith.constant dense<0.000000e+00> : vector<16xf32>
    %48 = vector.multi_reduction <add>, %47, %cst_31 [1] : vector<16x32xf32> to vector<16xf32>
    %49 = vector.shape_cast %48 : vector<16xf32> to vector<16x1xf32>
    %cst_32 = arith.constant 1.000000e-24 : f32
    %50 = vector.broadcast %cst_32 : f32 to vector<16x1xf32>
    %51 = arith.maximumf %49, %50 : vector<16x1xf32>
    %52 = math.rsqrt %51 : vector<16x1xf32>
    %53 = vector.broadcast %52 : vector<16x1xf32> to vector<16x32xf32>
    %54 = arith.mulf %46, %53 : vector<16x32xf32>
    %cst_33 = arith.constant 0.000000e+00 : f32
    %55 = vector.broadcast %cst_33 : f32 to vector<16x32xf32>
    %56 = arith.maximumf %54, %55 : vector<16x32xf32>
    %c1_34 = arith.constant 1 : index
    %c0_35 = arith.constant 0 : index
    %c0_36 = arith.constant 0 : index
    %57 = vector.load %arg5[%c1_34, %c0_35, %c0_36] : memref<2x16x32xf32, #tpu.memory_space<vmem>>, vector<1x16x32xf32>
    %58 = vector.shape_cast %57 : vector<1x16x32xf32> to vector<16x32xf32>
    %59 = vector.shape_cast %56 : vector<16x32xf32> to vector<1x16x32xf32>
    tpu.vector_store %arg5[%c1_34, %c0_35, %c0_36], %59 {strides = array<i32>} : memref<2x16x32xf32, #tpu.memory_space<vmem>>, vector<1x16x32xf32>,
    %60 = arith.mulf %56, %56 : vector<16x32xf32>
    %cst_37 = arith.constant dense<0.000000e+00> : vector<16xf32>
    %61 = vector.multi_reduction <add>, %60, %cst_37 [1] : vector<16x32xf32> to vector<16xf32>
    %62 = vector.shape_cast %61 : vector<16xf32> to vector<16x1xf32>
    %cst_38 = arith.constant 1.000000e-24 : f32
    %63 = vector.broadcast %cst_38 : f32 to vector<16x1xf32>
    %64 = arith.maximumf %62, %63 : vector<16x1xf32>
    %65 = math.rsqrt %64 : vector<16x1xf32>
    %66 = vector.broadcast %65 : vector<16x1xf32> to vector<16x32xf32>
    %67 = arith.mulf %56, %66 : vector<16x32xf32>
    %cst_39 = arith.constant dense<0.000000e+00> : vector<32x32xf32>
    %68 = tpu.matmul %56, %67, %cst_39 {dimension_numbers = #tpu.dot_dimension_numbers<[0], [0], [1], [1], [0, 1, 1, 1], [], []>} : vector<16x32xf32>, vector<16x32xf32>, vector<32x32xf32> -> vector<32x32xf32>
    %cst_40 = arith.constant dense<0.000000e+00> : vector<32x32xf32>
    %69 = tpu.matmul %67, %56, %cst_40 {dimension_numbers = #tpu.dot_dimension_numbers<[0], [0], [1], [1], [0, 1, 1, 1], [], []>} : vector<16x32xf32>, vector<16x32xf32>, vector<32x32xf32> -> vector<32x32xf32>
    %70 = arith.addf %68, %69 : vector<32x32xf32>
    %cst_41 = arith.constant 5.000000e-01 : f32
    %71 = vector.broadcast %cst_41 : f32 to vector<32x32xf32>
    %72 = arith.mulf %71, %70 : vector<32x32xf32>
    %c1_42 = arith.constant 1 : index
    %c0_43 = arith.constant 0 : index
    %c0_44 = arith.constant 0 : index
    %73 = vector.load %arg6[%c1_42, %c0_43, %c0_44] : memref<2x32x32xf32, #tpu.memory_space<vmem>>, vector<1x32x32xf32>
    %74 = vector.shape_cast %73 : vector<1x32x32xf32> to vector<32x32xf32>
    %75 = vector.shape_cast %72 : vector<32x32xf32> to vector<1x32x32xf32>
    tpu.vector_store %arg6[%c1_42, %c0_43, %c0_44], %75 {strides = array<i32>} : memref<2x32x32xf32, #tpu.memory_space<vmem>>, vector<1x32x32xf32>,
    %cst_45 = arith.constant dense<0.000000e+00> : vector<16xf32>
    %76 = vector.multi_reduction <add>, %19, %cst_45 [1] : vector<16x32xf32> to vector<16xf32>
    %77 = vector.shape_cast %76 : vector<16xf32> to vector<16x1xf32>
    %cst_46 = arith.constant 0.000000e+00 : f32
    %78 = vector.broadcast %cst_46 : f32 to vector<16x1xf32>
    %79 = arith.addf %78, %77 : vector<16x1xf32>
    %cst_47 = arith.constant dense<0.000000e+00> : vector<16xf32>
    %80 = vector.multi_reduction <add>, %56, %cst_47 [1] : vector<16x32xf32> to vector<16xf32>
    %81 = vector.shape_cast %80 : vector<16xf32> to vector<16x1xf32>
    %82 = arith.addf %79, %81 : vector<16x1xf32>
    %83 = arith.mulf %19, %19 : vector<16x32xf32>
    %cst_48 = arith.constant dense<0.000000e+00> : vector<16xf32>
    %84 = vector.multi_reduction <add>, %83, %cst_48 [1] : vector<16x32xf32> to vector<16xf32>
    %85 = vector.shape_cast %84 : vector<16xf32> to vector<16x1xf32>
    %cst_49 = arith.constant 0.000000e+00 : f32
    %86 = vector.broadcast %cst_49 : f32 to vector<16x1xf32>
    %87 = arith.addf %86, %85 : vector<16x1xf32>
    %88 = arith.mulf %56, %56 : vector<16x32xf32>
    %cst_50 = arith.constant dense<0.000000e+00> : vector<16xf32>
    %89 = vector.multi_reduction <add>, %88, %cst_50 [1] : vector<16x32xf32> to vector<16xf32>
    %90 = vector.shape_cast %89 : vector<16xf32> to vector<16x1xf32>
    %91 = arith.addf %87, %90 : vector<16x1xf32>
    %cst_51 = arith.constant 6.400000e+01 : f32
    %92 = vector.broadcast %cst_51 : f32 to vector<16x1xf32>
    %93 = arith.divf %82, %92 : vector<16x1xf32>
    %cst_52 = arith.constant 6.400000e+01 : f32
    %94 = vector.broadcast %cst_52 : f32 to vector<16x1xf32>
    %95 = arith.divf %91, %94 : vector<16x1xf32>
    %96 = arith.mulf %93, %93 : vector<16x1xf32>
    %97 = arith.subf %95, %96 : vector<16x1xf32>
    %cst_53 = arith.constant 0.000000e+00 : f32
    %98 = vector.broadcast %cst_53 : f32 to vector<16x1xf32>
    %99 = arith.maximumf %97, %98 : vector<16x1xf32>
    %cst_54 = arith.constant 9.99999974E-6 : f32
    %100 = vector.broadcast %cst_54 : f32 to vector<16x1xf32>
    %101 = arith.addf %99, %100 : vector<16x1xf32>
    %102 = math.rsqrt %101 : vector<16x1xf32>
    %103 = vector.broadcast %93 : vector<16x1xf32> to vector<16x32xf32>
    %104 = arith.subf %19, %103 : vector<16x32xf32>
    %105 = vector.broadcast %102 : vector<16x1xf32> to vector<16x32xf32>
    %106 = arith.mulf %104, %105 : vector<16x32xf32>
    %107 = vector.broadcast %93 : vector<16x1xf32> to vector<16x32xf32>
    %108 = arith.subf %56, %107 : vector<16x32xf32>
    %109 = vector.broadcast %102 : vector<16x1xf32> to vector<16x32xf32>
    %110 = arith.mulf %108, %109 : vector<16x32xf32>
    %c0_55 = arith.constant 0 : index
    %c0_56 = arith.constant 0 : index
    %c0_57 = arith.constant 0 : index
    %111 = vector.load %arg7[%c0_55, %c0_56, %c0_57] : memref<2x16x32xf32, #tpu.memory_space<vmem>>, vector<1x16x32xf32>
    %112 = vector.shape_cast %111 : vector<1x16x32xf32> to vector<16x32xf32>
    %113 = vector.shape_cast %106 : vector<16x32xf32> to vector<1x16x32xf32>
    tpu.vector_store %arg7[%c0_55, %c0_56, %c0_57], %113 {strides = array<i32>} : memref<2x16x32xf32, #tpu.memory_space<vmem>>, vector<1x16x32xf32>,
    %c1_58 = arith.constant 1 : index
    %c0_59 = arith.constant 0 : index
    %c0_60 = arith.constant 0 : index
    %114 = vector.load %arg7[%c1_58, %c0_59, %c0_60] : memref<2x16x32xf32, #tpu.memory_space<vmem>>, vector<1x16x32xf32>
    %115 = vector.shape_cast %114 : vector<1x16x32xf32> to vector<16x32xf32>
    %116 = vector.shape_cast %110 : vector<16x32xf32> to vector<1x16x32xf32>
    tpu.vector_store %arg7[%c1_58, %c0_59, %c0_60], %116 {strides = array<i32>} : memref<2x16x32xf32, #tpu.memory_space<vmem>>, vector<1x16x32xf32>,
    return
  }
  func.func @transform_0(%arg0: i32) -> (i32, i32, i32) {
    %c0_i32 = arith.constant 0 : i32
    %c0_i32_0 = arith.constant 0 : i32
    %c0_i32_1 = arith.constant 0 : i32
    %c0_i32_2 = arith.constant 0 : i32
    return %c0_i32, %c0_i32_0, %c0_i32_1 : i32, i32, i32
  }
  func.func @transform_1(%arg0: i32) -> (i32, i32, i32) {
    %c0_i32 = arith.constant 0 : i32
    %c0_i32_0 = arith.constant 0 : i32
    %c0_i32_1 = arith.constant 0 : i32
    %c0_i32_2 = arith.constant 0 : i32
    return %c0_i32, %c0_i32_0, %c0_i32_1 : i32, i32, i32
  }
  func.func @transform_2(%arg0: i32) -> (i32, i32) {
    %c0_i32 = arith.constant 0 : i32
    %c0_i32_0 = arith.constant 0 : i32
    %c0_i32_1 = arith.constant 0 : i32
    return %c0_i32, %c0_i32_0 : i32, i32
  }
  func.func @transform_3(%arg0: i32) -> (i32, i32) {
    %c0_i32 = arith.constant 0 : i32
    %c0_i32_0 = arith.constant 0 : i32
    %c0_i32_1 = arith.constant 0 : i32
    return %c0_i32, %c0_i32_0 : i32, i32
  }
  func.func @transform_4(%arg0: i32) -> (i32, i32, i32) {
    %c0_i32 = arith.constant 0 : i32
    %c0_i32_0 = arith.constant 0 : i32
    %c0_i32_1 = arith.constant 0 : i32
    %c0_i32_2 = arith.constant 0 : i32
    return %c0_i32, %c0_i32_0, %c0_i32_1 : i32, i32, i32
  }
  func.func @transform_5(%arg0: i32) -> (i32, i32, i32) {
    %c0_i32 = arith.constant 0 : i32
    %c0_i32_0 = arith.constant 0 : i32
    %c0_i32_1 = arith.constant 0 : i32
    %c0_i32_2 = arith.constant 0 : i32
    return %c0_i32, %c0_i32_0, %c0_i32_1 : i32, i32, i32
  }
  func.func @transform_6(%arg0: i32) -> (i32, i32, i32) {
    %c0_i32 = arith.constant 0 : i32
    %c0_i32_0 = arith.constant 0 : i32
    %c0_i32_1 = arith.constant 0 : i32
    %c0_i32_2 = arith.constant 0 : i32
    return %c0_i32, %c0_i32_0, %c0_i32_1 : i32, i32, i32
  }
}

</mosaic_0001>

<bundles_post_ra>
// kernel: tpu_custom_call.1
= control target key start
LH: loop header
LB: loop body
LE: loop exit
PB: predicated region body
PF: predicated region fallthrough
CT: control target
= control target key end

     0   :  { %12 = vsyncpa [#allocation3], 0  ;;  %vm28_vm0 = vcmask 130048   ;;  %s1075_s0 = inlined_call_operand.vmem [shape: f32[2,16,4], index: 0, kind: input, shape index: {}]   ;;  %s1076_s1 = inlined_call_operand.vmem [shape: f32[2,16,16], index: 1, kind: input, shape index: {}]   ;;  %s1077_s2 = inlined_call_operand.vmem [shape: f32[4,32], index: 2, kind: input, shape index: {}]   ;;  %s1078_s3 = inlined_call_operand.vmem [shape: f32[1,32], index: 3, kind: input, shape index: {}]   ;;  %s1079_s4 = inlined_call_operand.hbm [shape: f32[2,16,32], index: 4, kind: output, shape index: {0}]   ;;  %s1080_s5 = inlined_call_operand.hbm [shape: f32[2,32,32], index: 5, kind: output, shape index: {1}]   ;;  %s1081_s6 = inlined_call_operand.hbm [shape: f32[2,16,32], index: 6, kind: output, shape index: {2}]  }
   0x1   :  { %v25_v0 = vld [vmem:[%s1075_s0 + $0x8] sm:$0xff]  ;;  %v745_v1 = vld [vmem:[%s1075_s0 + $0x18] sm:$0xff]  ;;  %v24_v2 = vld [vmem:[%s1075_s0] sm:$0xff] }
   0x2   :  { %49 = vmatpush.msra.mxu2 %v25_v0  ;;  %344 = vmatpush.msra.mxu1 %v745_v1  ;;  %v744_v3 = vld [vmem:[%s1075_s0 + $0x10] sm:$0xff]  ;;  %v26_v4 = vld [vmem:[%s1076_s1] sm:$0xff] }
   0x3   :  { %v746_v5 = vld [vmem:[%s1076_s1 + $0x10] sm:$0xff] }
   0x4   :  { %50 = vmatpush.msra.mxu2 %v24_v2  ;;  %345 = vmatpush.msra.mxu1 %v744_v3 }
   0x5   :  { %13 = vsyncpa [#allocation5], 0  ;;  %731 = vmatmul.msk.f32.vlgmr.msra.gmra.mxu2 %vm28_vm0, %v26_v4  ;;  %748 = vmatmul.msk.f32.vlgmr.msra.gmra.mxu1 %vm28_vm0, %v746_v5  ;;  %v27_v6 = vld [vmem:[%s1076_s1 + $0x8] sm:$0xff]  ;;  %v747_v7 = vld [vmem:[%s1076_s1 + $0x18] sm:$0xff]  ;;  %vm68_vm1 = vcmask 1043456   ;;  %vm61_vm2 = vcmask 31744  }
   0x6   :  { %v22_v8 = vld [vmem:[%s1077_s2] sm:$0xf]  ;;  %vm97_vm3 = vcmask 261120   ;;  %s684_s15 = sshll.u32 %s1079_s4, 4  ;;  %s868_s16 = smov [#allocation2]   ;;  %s685_s15 = int_to_ptr.hbm [resolvable:$true] %s684_s15 }
   0x7   :  { %750 = vmatpush.msk.msra.mxu0 %vm68_vm1, %v22_v8  ;;  %733 = vmatpush.msk.msra.mxu3 %vm68_vm1, %v22_v8  ;;  %v768_v13 = vld [vmem:[%s1078_s3] ss:$0 sm:$0xff]  ;;  %s682_s17 = sshll.u32 %s868_s16, 4  ;;  %s869_s18 = smov 128   ;;  %s683_s17 = int_to_ptr.vmem [resolvable:$true] %s682_s17 }
   0x8   :  { %s870_s19 = smov 8   ;;  %s871_s4 = smov [#allocation4]  }
   0x9   :  { %s695_s20 = sshll.u32 %s871_s4, 4  ;;  %s697_s23 = sshll.u32 %s1080_s5, 4  ;;  %s696_s20 = int_to_ptr.vmem [resolvable:$true] %s695_s20  ;;  %s698_s23 = int_to_ptr.hbm [resolvable:$true] %s697_s23 }
   0xa   :  { %s872_s24 = smov [#allocation6]   ;;  %s710_s28 = sshll.u32 %s1081_s6, 4  ;;  %s711_s28 = int_to_ptr.hbm [resolvable:$true] %s710_s28 }
   0xb   :  { %s708_s25 = sshll.u32 %s872_s24, 4  ;;  %s709_s25 = int_to_ptr.vmem [resolvable:$true] %s708_s25 }
   0xd   :  { %732 = vmatmul.msk.f32.gmra.mxu2 %vm28_vm0, %v27_v6  ;;  %749 = vmatmul.msk.f32.gmra.mxu1 %vm28_vm0, %v747_v7 }
  0x82   :  { %v347_v9 = vpop.f32.mrf.mxu1 }
  0x83   :  { %751 = vmatmul.msk.f32.vlgmr.msra.gmra.mxu0 %vm61_vm2, %v347_v9 }
  0x88   :  { %v52_v10 = vpop.f32.mrf.mxu2 }
  0x89   :  { %734 = vmatmul.msk.f32.vlgmr.msra.gmra.mxu3 %vm61_vm2, %v52_v10 }
  0x8a   :  { %v350_v11 = vpop.f32.mrf.mxu1 }
  0x8b   :  { %752 = vmatmul.msk.f32.gmra.mxu0 %vm61_vm2, %v350_v11 }
  0x90   :  { %v55_v12 = vpop.f32.mrf.mxu2 }
  0x91   :  { %735 = vmatmul.msk.f32.gmra.mxu3 %vm61_vm2, %v55_v12 }
 0x100   :  { %v376_v14 = vpop.f32.mrf.mxu0 }
 0x101   :  { %v377_v15 = vadd.f32 %v768_v13, %v376_v14 }
 0x103   :  { %v382_v16 = vmul.f32 %v377_v15, %v377_v15 }
 0x105   :  { %v384_v17 = vsel %vm97_vm3, %v382_v16, 0.0 }
 0x106   :  { %385 = vadd.xlane.f32.xlu1 %v384_v17 }
 0x108   :  { %v379_v18 = vpop.f32.mrf.mxu0 }
 0x109   :  { %v380_v19 = vadd.f32 %v768_v13, %v379_v18 }
 0x10b   :  { %v383_v20 = vmul.f32 %v380_v19, %v380_v19 }
 0x10c   :  { %v89_v21 = vpop.f32.mrf.mxu3 }
 0x10d   :  { %v943_v22 = vadd.f32 %v768_v13, %v89_v21  ;;  %v387_v23 = vsel %vm97_vm3, %v383_v20, 0.0 }
 0x10e   :  { %388 = vadd.xlane.f32.xlu1 %v387_v23 }
 0x10f   :  { %v95_v24 = vmul.f32 %v943_v22, %v943_v22 }
 0x111   :  { %v98_v25 = vsel %vm97_vm3, %v95_v24, 0.0 }
 0x112   :  { %99 = vadd.xlane.f32.xlu0 %v98_v25 }
 0x114   :  { %v92_v26 = vpop.f32.mrf.mxu3 }
 0x115   :  { %v949_v27 = vadd.f32 %v768_v13, %v92_v26 }
 0x117   :  { %v96_v28 = vmul.f32 %v949_v27, %v949_v27 }
 0x119   :  { %v101_v29 = vsel %vm97_vm3, %v96_v28, 0.0 }
 0x11a   :  { %102 = vadd.xlane.f32.xlu0 %v101_v29 }
 0x179   :  { %v386_v30 = vpop.xlane.xlu1 %385 }
 0x17a   :  { %v390_v31 = vmax.f32 %v386_v30, 1e-24 }
 0x17c   :  { %769 = vrsqrt.f32 %v390_v31  ;;  %vm398_vm5 = vweird.f32 %v390_v31 }
 0x181   :  { %v389_v32 = vpop.xlane.xlu1 %388 }
 0x182   :  { %v770_v33 = vpop.eup %769  ;;  %v391_v34 = vmax.f32 %v389_v32, 1e-24 }
 0x183   :  { %v393_v35 = vmul.f32 %v770_v33, %v390_v31  ;;  %vm399_vm4 = vweird.f32 %v770_v33 }
 0x184   :  { %771 = vrsqrt.f32 %v391_v34  ;;  %vm400_vm6 = vmor %vm398_vm5, %vm399_vm4  ;;  %vm408_vm8 = vweird.f32 %v391_v34 }
 0x185   :  { %v394_v36 = vmul.f32 %v770_v33, %v393_v35  ;;  %v100_v37 = vpop.xlane.xlu0 %99 }
 0x186   :  { %v104_v38 = vmax.f32 %v100_v37, 1e-24 }
 0x187   :  { %v395_v39 = vmul.f32 0.5, %v394_v36 }
 0x188   :  { %773 = vrsqrt.f32 %v104_v38  ;;  %vm112_vm9 = vweird.f32 %v104_v38 }
 0x189   :  { %v396_v40 = vsub.f32 1.5, %v395_v39 }
 0x18a   :  { %v772_v41 = vpop.eup %771 }
 0x18b   :  { %v397_v42 = vmul.f32 %v770_v33, %v396_v40  ;;  %v403_v43 = vmul.f32 %v772_v41, %v391_v34  ;;  %vm409_vm7 = vweird.f32 %v772_v41 }
 0x18c   :  { %vm410_vm11 = vmor %vm408_vm8, %vm409_vm7 }
 0x18d   :  { %v401_v44 = vsel %vm400_vm6, %v770_v33, %v397_v42  ;;  %v404_v45 = vmul.f32 %v772_v41, %v403_v43  ;;  %v103_v46 = vpop.xlane.xlu0 %102 }
 0x18e   :  { %v774_v47 = vpop.eup %773  ;;  %v412_v48 = vmul.f32 %v401_v44, %v377_v15  ;;  %v105_v49 = vmax.f32 %v103_v46, 1e-24 }
 0x18f   :  { %v405_v50 = vmul.f32 0.5, %v404_v45  ;;  %v107_v51 = vmul.f32 %v774_v47, %v104_v38  ;;  %vm113_vm10 = vweird.f32 %v774_v47 }
 0x190   :  { %v954_v52 = vmax.f32 %v412_v48, 0.0  ;;  %775 = vrsqrt.f32 %v105_v49  ;;  %vm114_vm12 = vmor %vm112_vm9, %vm113_vm10  ;;  %vm122_vm13 = vweird.f32 %v105_v49 }
 0x191   :  { %v406_v53 = vsub.f32 1.5, %v405_v50  ;;  %v108_v54 = vmul.f32 %v774_v47, %v107_v51 }
 0x192   :  { %417 = vst.msk [vmem:[#allocation2 + $0x10] sm:$0xff] %vm97_vm3, %v954_v52  ;;  %524 = vxpose.xlu2.b32.start [1/2] (short) (narrow) %v954_v52, 32  ;;  %v419_v55 = vmul.f32 %v954_v52, %v954_v52 }
 0x193   :  { %v407_v56 = vmul.f32 %v772_v41, %v406_v53  ;;  %v109_v57 = vmul.f32 0.5, %v108_v54 }
 0x194   :  { %v421_v58 = vsel %vm97_vm3, %v419_v55, 0.0 }
 0x195   :  { %v411_v59 = vsel %vm410_vm11, %v772_v41, %v407_v56  ;;  %v110_v60 = vsub.f32 1.5, %v109_v57  ;;  %422 = vadd.xlane.f32.xlu0 %v421_v58 }
 0x196   :  { %v776_v61 = vpop.eup %775  ;;  %v413_v62 = vmul.f32 %v411_v59, %v380_v19 }
 0x197   :  { %v111_v63 = vmul.f32 %v774_v47, %v110_v60  ;;  %v117_v0 = vmul.f32 %v776_v61, %v105_v49  ;;  %vm123_vm14 = vweird.f32 %v776_v61 }
 0x198   :  { %v962_v1 = vmax.f32 %v413_v62, 0.0  ;;  %vm124_vm15 = vmor %vm122_vm13, %vm123_vm14 }
 0x199   :  { %v115_v2 = vsel %vm114_vm12, %v774_v47, %v111_v63  ;;  %v118_v3 = vmul.f32 %v776_v61, %v117_v0 }
 0x19a   :  { %418 = vst.msk [vmem:[#allocation2 + $0x18] sm:$0xff] %vm97_vm3, %v962_v1  ;;  %v126_v4 = vmul.f32 %v115_v2, %v943_v22  ;;  %525 = vxpose.xlu2.b32.end [2/2] (short) (narrow) %v962_v1, 32  ;;  %509 = vmatpush.msrb.mxu1 %v962_v1  ;;  %v420_v5 = vmul.f32 %v962_v1, %v962_v1  ;;  %v617_v43 = vsel %vm97_vm3, %v962_v1, 0.0 }
 0x19b   :  { %v119_v6 = vmul.f32 0.5, %v118_v3 }
 0x19c   :  { %v971_v7 = vmax.f32 %v126_v4, 0.0  ;;  %510 = vmatpush.msrb.mxu1 %v954_v52  ;;  %v424_v8 = vsel %vm97_vm3, %v420_v5, 0.0 }
 0x19d   :  { %v120_v9 = vsub.f32 1.5, %v119_v6  ;;  %425 = vadd.xlane.f32.xlu1 %v424_v8 }
 0x19e   :  { %130 = vst.msk [vmem:[#allocation2] sm:$0xff] %vm97_vm3, %v971_v7  ;;  %v606_v10 = vsel %vm97_vm3, %v971_v7, 0.0  ;;  %v132_v23 = vmul.f32 %v971_v7, %v971_v7 }
 0x19f   :  { %v121_v11 = vmul.f32 %v776_v61, %v120_v9  ;;  %607 = vadd.xlane.f32.xlu0 %v606_v10 }
 0x1a1   :  { %v125_v12 = vsel %vm124_vm15, %v776_v61, %v121_v11 }
 0x1a2   :  { %v127_v13 = vmul.f32 %v125_v12, %v949_v27  ;;  %v134_v27 = vsel %vm97_vm3, %v132_v23, 0.0 }
 0x1a4   :  { %v980_v14 = vmax.f32 %v127_v13, 0.0  ;;  %v867_v13 = vmov 64.0  }
 0x1a6   :  { %131 = vst.msk [vmem:[#allocation2 + $0x8] sm:$0xff] %vm97_vm3, %v980_v14  ;;  %222 = vmatpush.msrb.mxu2 %v980_v14  ;;  %v133_v33 = vmul.f32 %v980_v14, %v980_v14  ;;  %v609_v47 = vsel %vm97_vm3, %v980_v14, 0.0 }
 0x1a7   :  { %690 = dma.vmem_to_hbm [thread:$0]  %s683_s17, 512, %s685_s15, [#allocation3], %s869_s18, %s869_s18, %s870_s19  }
 0x1a8   :  { %223 = vmatpush.msrb.mxu2 %v971_v7  ;;  %v137_v35 = vsel %vm97_vm3, %v133_v33, 0.0 }
 0x1c8   :  { %237 = vxpose.xlu0.b32.start [1/2] (short) (narrow) %v971_v7, 32 }
 0x1d0   :  { %238 = vxpose.xlu0.b32.end [2/2] (short) (narrow) %v980_v14, 32 }
 0x208   :  { %v988_v15 = vpop.xlane.xlu0 %422 }
 0x209   :  { %v427_v16 = vmax.f32 %v988_v15, 1e-24 }
 0x20b   :  { %777 = vrsqrt.f32 %v427_v16  ;;  %vm435_vm2 = vweird.f32 %v427_v16 }
 0x210   :  { %v991_v17 = vpop.xlane.xlu1 %425 }
 0x211   :  { %v778_v18 = vpop.eup %777  ;;  %v428_v19 = vmax.f32 %v991_v17, 1e-24 }
 0x212   :  { %v430_v20 = vmul.f32 %v778_v18, %v427_v16  ;;  %vm436_vm1 = vweird.f32 %v778_v18  ;;  %v1013_v58 = vpop.xlane.xlu0 %607 }
 0x213   :  { %779 = vrsqrt.f32 %v428_v19  ;;  %vm437_vm4 = vmor %vm435_vm2, %vm436_vm1  ;;  %vm445_vm6 = vweird.f32 %v428_v19 }
 0x214   :  { %v431_v21 = vmul.f32 %v778_v18, %v430_v20 }
 0x216   :  { %v432_v22 = vmul.f32 0.5, %v431_v21 }
 0x218   :  { %v433_v24 = vsub.f32 1.5, %v432_v22 }
 0x219   :  { %v780_v25 = vpop.eup %779 }
 0x21a   :  { %v440_v26 = vmul.f32 %v780_v25, %v428_v19  ;;  %v434_v28 = vmul.f32 %v778_v18, %v433_v24  ;;  %vm446_vm5 = vweird.f32 %v780_v25 }
 0x21b   :  { %135 = vadd.xlane.f32.xlu2 %v134_v27  ;;  %vm447_vm7 = vmor %vm445_vm6, %vm446_vm5 }
 0x21c   :  { %v441_v29 = vmul.f32 %v780_v25, %v440_v26  ;;  %v438_v30 = vsel %vm437_vm4, %v778_v18, %v434_v28 }
 0x21d   :  { %v449_v31 = vmul.f32 %v438_v30, %v954_v52 }
 0x21e   :  { %v442_v32 = vmul.f32 0.5, %v441_v29 }
 0x21f   :  { %451 = vxpose.xlu1.b32.start [1/2] (short) (narrow) %v449_v31, 32 }
 0x220   :  { %v443_v34 = vsub.f32 1.5, %v442_v32 }
 0x222   :  { %v444_v36 = vmul.f32 %v780_v25, %v443_v34 }
 0x223   :  { %138 = vadd.xlane.f32.xlu2 %v137_v35 }
 0x224   :  { %v448_v37 = vsel %vm447_vm7, %v780_v25, %v444_v36 }
 0x225   :  { %v450_v38 = vmul.f32 %v448_v37, %v962_v1 }
 0x227   :  { %582 = vmatpush.msrb.mxu0 %v450_v38  ;;  %452 = vxpose.xlu1.b32.end [2/2] (short) (narrow) %v450_v38, 32 }
 0x229   :  { %583 = vmatpush.msrb.mxu0 %v449_v31 }
 0x22b   :  { %v540_v39 = vpop.trf.xlu2 }
 0x22c   :  { %757 = vmatmul.msk.f32.vlgmr.msrb.gmra.mxu0 %vm28_vm0, %v540_v39 }
 0x233   :  { %v541_v40 = vpop.trf.xlu2 }
 0x234   :  { %758 = vmatmul.msk.f32.gmra.mxu0 %vm28_vm0, %v541_v40 }
 0x23b   :  { %v542_v41 = vpop.trf.xlu2 }
 0x23c   :  { %759 = vmatmul.msk.f32.gmra.mxu0 %vm28_vm0, %v542_v41 }
 0x243   :  { %v543_v42 = vpop.trf.xlu2 }
 0x244   :  { %760 = vmatmul.msk.f32.gmra.mxu0 %vm28_vm0, %v543_v42 }
 0x251   :  { %618 = vadd.xlane.f32.xlu0 %v617_v43  ;;  %v614_v43 = vsel %vm97_vm3, %v954_v52, 0.0 }
 0x26c   :  { %v253_v2 = vpop.trf.xlu0 }
 0x274   :  { %v254_v5 = vpop.trf.xlu0 }
 0x27c   :  { %v255_v6 = vpop.trf.xlu0 }
 0x284   :  { %v256_v9 = vpop.trf.xlu0 }
 0x28e   :  { %v1008_v44 = vpop.xlane.xlu2 %135 }
 0x28f   :  { %v140_v45 = vmax.f32 %v1008_v44, 1e-24 }
 0x291   :  { %781 = vrsqrt.f32 %v140_v45  ;;  %vm148_vm9 = vweird.f32 %v140_v45 }
 0x296   :  { %v139_v46 = vpop.xlane.xlu2 %138 }
 0x297   :  { %v782_v48 = vpop.eup %781  ;;  %v141_v49 = vmax.f32 %v139_v46, 1e-24  ;;  %610 = vadd.xlane.f32.xlu1 %v609_v47  ;;  %v625_v24 = vadd.f32 %v991_v17, %v139_v46 }
 0x298   :  { %v143_v50 = vmul.f32 %v782_v48, %v140_v45  ;;  %vm149_vm8 = vweird.f32 %v782_v48 }
 0x299   :  { %783 = vrsqrt.f32 %v141_v49  ;;  %vm150_vm10 = vmor %vm148_vm9, %vm149_vm8  ;;  %vm158_vm12 = vweird.f32 %v141_v49 }
 0x29a   :  { %v144_v51 = vmul.f32 %v782_v48, %v143_v50  ;;  %785 = vrcp.f32 %v867_v13 }
 0x29c   :  { %v145_v53 = vmul.f32 0.5, %v144_v51 }
 0x29e   :  { %v146_v54 = vsub.f32 1.5, %v145_v53 }
 0x29f   :  { %v784_v55 = vpop.eup %783 }
 0x2a0   :  { %v153_v56 = vmul.f32 %v784_v55, %v141_v49  ;;  %v147_v57 = vmul.f32 %v782_v48, %v146_v54  ;;  %vm159_vm11 = vweird.f32 %v784_v55  ;;  %v786_v16 = vpop.eup %785 }
 0x2a1   :  { %vm160_vm13 = vmor %vm158_vm12, %vm159_vm11  ;;  %v627_v18 = vmul.f32 64.0, %v786_v16  ;;  %vm631_vm14 = vweird.f32 %v786_v16 }
 0x2a2   :  { %v154_v59 = vmul.f32 %v784_v55, %v153_v56  ;;  %v151_v60 = vsel %vm150_vm10, %v782_v48, %v147_v57 }
 0x2a3   :  { %v162_v61 = vmul.f32 %v151_v60, %v971_v7  ;;  %v628_v19 = vsub.f32 1.0, %v627_v18 }
 0x2a4   :  { %v155_v62 = vmul.f32 0.5, %v154_v59 }
 0x2a5   :  { %164 = vxpose.xlu2.b32.start [1/2] (short) (narrow) %v162_v61, 32  ;;  %v629_v20 = vmul.f32 %v786_v16, %v628_v19 }
 0x2a6   :  { %v156_v63 = vsub.f32 1.5, %v155_v62 }
 0x2a7   :  { %v630_v21 = vadd.f32 %v786_v16, %v629_v20 }
 0x2a8   :  { %v157_v0 = vmul.f32 %v784_v55, %v156_v63 }
 0x2a9   :  { %v1026_v26 = vsel %vm631_vm14, %v786_v16, %v630_v21  ;;  %v585_v45 = vpop.f32.mrf.mxu0 }
 0x2aa   :  { %v161_v3 = vsel %vm160_vm13, %v784_v55, %v157_v0  ;;  %v636_v28 = vmul.f32 %v1026_v26, %v625_v24 }
 0x2ab   :  { %v163_v4 = vmul.f32 %v161_v3, %v980_v14  ;;  %v624_v3 = vadd.f32 %v988_v15, %v1008_v44 }
 0x2ad   :  { %165 = vxpose.xlu2.b32.end [2/2] (short) (narrow) %v163_v4, 32  ;;  %295 = vmatpush.msrb.mxu3 %v163_v4 }
 0x2af   :  { %296 = vmatpush.msrb.mxu3 %v162_v61 }
 0x2b0   :  { %740 = vmatmul.msk.f32.vlgmr.msrb.gmra.mxu3 %vm28_vm0, %v253_v2 }
 0x2b1   :  { %v588_v49 = vpop.f32.mrf.mxu0 }
 0x2b8   :  { %741 = vmatmul.msk.f32.gmra.mxu3 %vm28_vm0, %v254_v5 }
 0x2b9   :  { %v591_v55 = vpop.f32.mrf.mxu0 }
 0x2c0   :  { %742 = vmatmul.msk.f32.gmra.mxu3 %vm28_vm0, %v255_v6  ;;  %v635_v6 = vmul.f32 %v1026_v26, %v624_v3 }
 0x2c1   :  { %v594_v61 = vpop.f32.mrf.mxu0 }
 0x2c3   :  { %v467_v8 = vpop.trf.xlu1 }
 0x2c4   :  { %753 = vmatmul.msk.f32.vlgmr.msrb.gmra.mxu1 %vm28_vm0, %v467_v8  ;;  %v619_v22 = vpop.xlane.xlu0 %618 }
 0x2c8   :  { %743 = vmatmul.msk.f32.gmra.mxu3 %vm28_vm0, %v256_v9 }
 0x2cb   :  { %v468_v10 = vpop.trf.xlu1 }
 0x2cc   :  { %754 = vmatmul.msk.f32.gmra.mxu1 %vm28_vm0, %v468_v10 }
 0x2d3   :  { %v469_v11 = vpop.trf.xlu1 }
 0x2d4   :  { %755 = vmatmul.msk.f32.gmra.mxu1 %vm28_vm0, %v469_v11 }
 0x2db   :  { %v470_v12 = vpop.trf.xlu1 }
 0x2dc   :  { %756 = vmatmul.msk.f32.gmra.mxu1 %vm28_vm0, %v470_v12 }
 0x30a   :  { %v611_v23 = vpop.xlane.xlu1 %610 }
 0x30b   :  { %v621_v25 = vadd.f32 %v619_v22, %v611_v23 }
 0x30d   :  { %v634_v27 = vmul.f32 %v1026_v26, %v621_v25 }
 0x30f   :  { %v638_v29 = vmul.f32 %v634_v27, %v634_v27  ;;  %v666_v17 = vsub.f32 %v980_v14, %v634_v27  ;;  %v670_v39 = vsub.f32 %v962_v1, %v634_v27 }
 0x311   :  { %v640_v30 = vsub.f32 %v636_v28, %v638_v29 }
 0x313   :  { %v642_v31 = vmax.f32 %v640_v30, 0.0 }
 0x315   :  { %v644_v32 = vadd.f32 1e-05, %v642_v31 }
 0x317   :  { %787 = vrsqrt.f32 %v644_v32  ;;  %vm661_vm1 = vweird.f32 %v644_v32 }
 0x31d   :  { %v788_v33 = vpop.eup %787 }
 0x31e   :  { %v656_v34 = vmul.f32 %v788_v33, %v644_v32  ;;  %vm662_vm15 = vweird.f32 %v788_v33 }
 0x31f   :  { %vm663_vm2 = vmor %vm661_vm1, %vm662_vm15 }
 0x320   :  { %v657_v35 = vmul.f32 %v788_v33, %v656_v34 }
 0x322   :  { %v658_v36 = vmul.f32 0.5, %v657_v35 }
 0x324   :  { %v659_v37 = vsub.f32 1.5, %v658_v36 }
 0x326   :  { %v660_v38 = vmul.f32 %v788_v33, %v659_v37 }
 0x328   :  { %v664_v40 = vsel %vm663_vm2, %v788_v33, %v660_v38 }
 0x329   :  { %v668_v41 = vmul.f32 %v666_v17, %v664_v40  ;;  %v672_v42 = vmul.f32 %v670_v39, %v664_v40 }
 0x32b   :  { %674 = vst.msk [vmem:[#allocation6 + $0x8] sm:$0xff] %vm97_vm3, %v668_v41 }
 0x32c   :  { %677 = vst.msk [vmem:[#allocation6 + $0x18] sm:$0xff] %vm97_vm3, %v672_v42 }
 0x32e   :  { %615 = vadd.xlane.f32.xlu2 %v614_v43 }
 0x333   :  { %v298_v19 = vpop.f32.mrf.mxu3 }
 0x33e   :  { %v180_v46 = vpop.trf.xlu2 }
 0x33f   :  { %736 = vmatmul.msk.f32.vlgmr.msrb.gmra.mxu2 %vm28_vm0, %v180_v46 }
 0x341   :  { %v512_v47 = vpop.f32.mrf.mxu1 }
 0x342   :  { %v586_v48 = vadd.f32 %v585_v45, %v512_v47 }
 0x344   :  { %v597_v14 = vmul.f32 0.5, %v586_v48 }
 0x346   :  { %602 = vst.msk [vmem:[#allocation4 + $0x20] sm:$0xff] %vm97_vm3, %v597_v14  ;;  %v181_v1 = vpop.trf.xlu2 }
 0x347   :  { %737 = vmatmul.msk.f32.gmra.mxu2 %vm28_vm0, %v181_v1 }
 0x349   :  { %v515_v50 = vpop.f32.mrf.mxu1 }
 0x34a   :  { %v589_v51 = vadd.f32 %v588_v49, %v515_v50 }
 0x34c   :  { %v598_v53 = vmul.f32 0.5, %v589_v51 }
 0x34e   :  { %603 = vst.msk [vmem:[#allocation4 + $0x28] sm:$0xff] %vm97_vm3, %v598_v53  ;;  %v182_v54 = vpop.trf.xlu2 }
 0x34f   :  { %738 = vmatmul.msk.f32.gmra.mxu2 %vm28_vm0, %v182_v54 }
 0x351   :  { %v518_v56 = vpop.f32.mrf.mxu1 }
 0x352   :  { %v592_v57 = vadd.f32 %v591_v55, %v518_v56 }
 0x354   :  { %v599_v59 = vmul.f32 0.5, %v592_v57 }
 0x356   :  { %604 = vst.msk [vmem:[#allocation4 + $0x30] sm:$0xff] %vm97_vm3, %v599_v59  ;;  %v183_v60 = vpop.trf.xlu2 }
 0x357   :  { %739 = vmatmul.msk.f32.gmra.mxu2 %vm28_vm0, %v183_v60 }
 0x359   :  { %v521_v62 = vpop.f32.mrf.mxu1 }
 0x35a   :  { %v595_v63 = vadd.f32 %v594_v61, %v521_v62 }
 0x35c   :  { %v600_v0 = vmul.f32 0.5, %v595_v63 }
 0x35e   :  { %605 = vst.msk [vmem:[#allocation4 + $0x38] sm:$0xff] %vm97_vm3, %v600_v0 }
 0x3a1   :  { %v616_v2 = vpop.xlane.xlu2 %615 }
 0x3a2   :  { %v620_v4 = vadd.f32 %v616_v2, %v1013_v58 }
 0x3a4   :  { %v633_v5 = vmul.f32 %v1026_v26, %v620_v4  ;;  %v301_v26 = vpop.f32.mrf.mxu3 }
 0x3a6   :  { %v637_v8 = vmul.f32 %v633_v5, %v633_v5  ;;  %v665_v15 = vsub.f32 %v971_v7, %v633_v5  ;;  %v669_v44 = vsub.f32 %v954_v52, %v633_v5 }
 0x3a8   :  { %v639_v9 = vsub.f32 %v635_v6, %v637_v8 }
 0x3aa   :  { %v641_v10 = vmax.f32 %v639_v9, 0.0 }
 0x3ac   :  { %v643_v11 = vadd.f32 1e-05, %v641_v10  ;;  %v304_v31 = vpop.f32.mrf.mxu3 }
 0x3ae   :  { %789 = vrsqrt.f32 %v643_v11  ;;  %vm651_vm4 = vweird.f32 %v643_v11 }
 0x3b4   :  { %v790_v12 = vpop.eup %789  ;;  %v307_v33 = vpop.f32.mrf.mxu3 }
 0x3b5   :  { %v646_v13 = vmul.f32 %v790_v12, %v643_v11  ;;  %vm652_vm0 = vweird.f32 %v790_v12 }
 0x3b6   :  { %vm653_vm5 = vmor %vm651_vm4, %vm652_vm0 }
 0x3b7   :  { %v647_v16 = vmul.f32 %v790_v12, %v646_v13 }
 0x3b9   :  { %v648_v18 = vmul.f32 0.5, %v647_v16 }
 0x3bb   :  { %v649_v20 = vsub.f32 1.5, %v648_v18 }
 0x3bd   :  { %v650_v21 = vmul.f32 %v790_v12, %v649_v20 }
 0x3bf   :  { %v654_v58 = vsel %vm653_vm5, %v790_v12, %v650_v21 }
 0x3c0   :  { %v667_v22 = vmul.f32 %v665_v15, %v654_v58  ;;  %v671_v23 = vmul.f32 %v669_v44, %v654_v58 }
 0x3c2   :  { %673 = vst.msk [vmem:[#allocation6] sm:$0xff] %vm97_vm3, %v667_v22  ;;  %v225_v24 = vpop.f32.mrf.mxu2 }
 0x3c3   :  { %676 = vst.msk [vmem:[#allocation6 + $0x10] sm:$0xff] %vm97_vm3, %v671_v23  ;;  %v299_v25 = vadd.f32 %v298_v19, %v225_v24 }
 0x3c5   :  { %v310_v27 = vmul.f32 0.5, %v299_v25 }
 0x3c7   :  { %314 = vst.msk [vmem:[#allocation4] sm:$0xff] %vm97_vm3, %v310_v27 }
 0x3ca   :  { %v228_v28 = vpop.f32.mrf.mxu2 }
 0x3cb   :  { %v302_v29 = vadd.f32 %v301_v26, %v228_v28 }
 0x3cd   :  { %v311_v30 = vmul.f32 0.5, %v302_v29 }
 0x3cf   :  { %315 = vst.msk [vmem:[#allocation4 + $0x8] sm:$0xff] %vm97_vm3, %v311_v30 }
 0x3d2   :  { %v231_v52 = vpop.f32.mrf.mxu2 }
 0x3d3   :  { %v305_v7 = vadd.f32 %v304_v31, %v231_v52 }
 0x3d5   :  { %v312_v32 = vmul.f32 0.5, %v305_v7 }
 0x3d7   :  { %316 = vst.msk [vmem:[#allocation4 + $0x10] sm:$0xff] %vm97_vm3, %v312_v32 }
 0x3da   :  { %v234_v34 = vpop.f32.mrf.mxu2 }
 0x3db   :  { %v308_v35 = vadd.f32 %v307_v33, %v234_v34 }
 0x3dd   :  { %v313_v36 = vmul.f32 0.5, %v308_v35 }
 0x3df   :  { %317 = vst.msk [vmem:[#allocation4 + $0x18] sm:$0xff] %vm97_vm3, %v313_v36 }
 0x3e0   :  { %703 = dma.vmem_to_hbm [thread:$0]  %s696_s20, 1024, %s698_s23, [#allocation5], %s869_s18, %s869_s18, %s870_s19  }
 0x3e1   :  { %716 = dma.vmem_to_hbm [thread:$0]  %s709_s25, 512, %s711_s28, [#allocation5], %s869_s18, %s869_s18, %s870_s19  }
 0x3e2   :  { %863 = dma.done.wait [#allocation3], 512  }
 0x3e3   :  { %864 = vsyncadd [#allocation3], 4294966784 }
 0x3e4   :  { %865 = dma.done.wait [#allocation5], 1536  }
 0x3e5   :  { %866 = vsyncadd [#allocation5], 4294965760 }
 0x3e6   :  { %729 = vsyncpa [#allocation3], 1 }
 0x3e7   :  { %730 = vsyncpa [#allocation5], 1 }

</bundles_post_ra>
